<compile_context>
chip_gen: v7x
topology: tpu7x:2x2x1
jax: 0.10.0
libtpu: 0.0.40
codegen_flags: <defaults>
</compile_context>

<pallas_src>
import functools

import jax
import jax.numpy as jnp
from jax import lax
from jax.experimental import pallas as pl
from jax.experimental.pallas import tpu as pltpu

_MIB = 1024 * 1024


def _motion_diff_kernel(x_ref, o_ref, *, fold, split):
    """Aliased path: the block holds ONLY the 2*fold diff channels.

    x_ref, o_ref: (1, n_segment, 2*fold, hw_tile) VMEM tiles.  The
    pass-through channels [2*fold:) never enter VMEM; they are preserved in
    HBM by the input/output alias.
    """
    _, n_seg, c_blk, hw = x_ref.shape

    if not split:
        # fold not sublane-aligned -> one hoisted (c_blk, 1) mask that
        # broadcasts along lanes (near-zero vreg cost).
        ch = lax.broadcasted_iota(jnp.int32, (c_blk, 1), 0)
        m_fwd = ch < fold

    # Carry prev/cur/nxt so each temporal slab is read from VMEM once.
    prev = None
    cur = x_ref[0, 0]                               # (c_blk, hw)
    for t in range(n_seg):                          # small static trip count
        nxt = x_ref[0, t + 1] if t + 1 < n_seg else None
        if split:
            # Static, sublane-aligned channel slices: no masks / selects.
            if nxt is not None:
                fwd = nxt[:fold] - cur[:fold]
            else:
                fwd = jnp.zeros((fold, hw), cur.dtype)
            if prev is not None:
                bwd = cur[fold:] - prev[fold:]
            else:
                bwd = jnp.zeros((c_blk - fold, hw), cur.dtype)
            o_ref[0, t, :fold] = fwd.astype(o_ref.dtype)
            o_ref[0, t, fold:] = bwd.astype(o_ref.dtype)
        else:
            fwd = (nxt - cur) if nxt is not None else jnp.zeros_like(cur)
            bwd = (cur - prev) if prev is not None else jnp.zeros_like(cur)
            o_ref[0, t] = jnp.where(m_fwd, fwd, bwd).astype(o_ref.dtype)
        prev = cur
        cur = nxt


def _motion_full_kernel(x_ref, o_ref, *, fold):
    """Fallback path: the block holds all c channels (diff + pass-through)."""
    _, n_seg, c, hw = x_ref.shape

    # Hoisted (c, 1) masks (sublane splats, broadcast along lanes).
    ch = lax.broadcasted_iota(jnp.int32, (c, 1), 0)
    m_fwd = ch < fold            # channels [0, fold)      -> x[t+1] - x[t]
    m_bwd = ch < 2 * fold        # channels [fold, 2*fold) -> x[t]   - x[t-1]

    prev = None
    cur = x_ref[0, 0]                               # (c, hw)
    for t in range(n_seg):
        nxt = x_ref[0, t + 1] if t + 1 < n_seg else None
        fwd = (nxt - cur) if nxt is not None else jnp.zeros_like(cur)
        bwd = (cur - prev) if prev is not None else jnp.zeros_like(cur)
        out = jnp.where(m_fwd, fwd, jnp.where(m_bwd, bwd, cur))
        o_ref[0, t] = out.astype(o_ref.dtype)
        prev = cur
        cur = nxt
    # TODO(synk): for n_segment >= ~16 switch to lax.fori_loop with dynamic
    # x_ref[0, t] indexing to bound live ranges (not needed at these sizes).


def _pick_hw_tile(hw, c_blk, n_segment, itemsize, max_block_bytes):
    def bytes_for(hw_t):
        return n_segment * c_blk * hw_t * itemsize

    if bytes_for(hw) <= max_block_bytes:
        return hw                                   # whole contiguous rows
    if hw % 128 != 0:
        # TODO(synk): for huge hw that is not a multiple of 128, tile the
        # channel/batch axis instead; such shapes are not expected here.
        return hw
    for mult in range(hw // 128, 0, -1):            # largest lane-dense divisor
        cand = 128 * mult
        if hw % cand == 0 and bytes_for(cand) <= max_block_bytes:
            return cand
    return 128


def motion_replace_block_b(x, n_segment, n_div, *, max_block_bytes=None):
    """x: (nt, c, h, w) -> (nt, c, h, w), matching the PyTorch forward."""
    nt, c, h, w = x.shape
    assert nt % n_segment == 0
    n_batch = nt // n_segment
    fold = c // n_div
    hw = h * w
    itemsize = jnp.dtype(x.dtype).itemsize
    sublane = max(8, 32 // itemsize)                # 8 f32 / 16 bf16 / 32 i8

    # Generation-aware budgets (v7x: 64 MiB VMEM per TC; v5e/v6e: 128 MiB).
    try:
        vmem_bytes = int(pltpu.get_tpu_info().vmem_capacity_bytes)
    except Exception:
        vmem_bytes = 64 * _MIB
    if max_block_bytes is None:
        max_block_bytes = 4 * _MIB if vmem_bytes <= 64 * _MIB else 8 * _MIB
    vmem_limit = int(min(vmem_bytes // 2, 48 * _MIB))

    # (n_batch, n_segment, c, hw): spatial on the lane axis, channels sublane.
    # TODO(synk): for very small spatial maps (hw < 128) stores are masked;
    # flattening (c, hw) onto the lane axis would make them lane-dense.
    x5 = x.reshape(n_batch, n_segment, c, hw)

    # Aliased path: only the 2*fold diff channels move HBM<->VMEM; the
    # pass-through channels are preserved by the input/output alias.
    use_alias = 0 < 2 * fold < c and (2 * fold) % sublane == 0
    c_blk = 2 * fold if use_alias else c

    hw_tile = _pick_hw_tile(hw, c_blk, n_segment, itemsize, max_block_bytes)
    num_hw_tiles = hw // hw_tile

    blk = (1, n_segment, c_blk, hw_tile)
    in_spec = pl.BlockSpec(blk, lambda b, s: (b, 0, 0, s))
    out_spec = pl.BlockSpec(blk, lambda b, s: (b, 0, 0, s))

    if use_alias:
        kernel = functools.partial(
            _motion_diff_kernel, fold=fold, split=(fold % sublane == 0))
    else:
        kernel = functools.partial(_motion_full_kernel, fold=fold)

    out5 = pl.pallas_call(
        kernel,
        out_shape=jax.ShapeDtypeStruct((n_batch, n_segment, c, hw), x.dtype),
        grid_spec=pltpu.PrefetchScalarGridSpec(
            num_scalar_prefetch=0,
            grid=(n_batch, num_hw_tiles),
            in_specs=[in_spec],
            out_specs=out_spec,
        ),
        input_output_aliases={0: 0} if use_alias else {},
        compiler_params=pltpu.CompilerParams(
            # Both grid axes independent; leading batch axis shards across
            # the two TensorCores on v7x (no-op on v5e/v6e).
            dimension_semantics=("parallel", "parallel"),
            vmem_limit_bytes=vmem_limit,
        ),
    )(x5)

    return out5.reshape(nt, c, h, w)


def _reference(x, n_segment, n_div):
    nt, c, h, w = x.shape
    n_batch = nt // n_segment
    fold = c // n_div
    xv = x.reshape(n_batch, n_segment, c, h, w)
    out = jnp.zeros_like(xv)
    out = out.at[:, :-1, :fold].set(xv[:, 1:, :fold] - xv[:, :-1, :fold])
    out = out.at[:, 1:, fold:2 * fold].set(
        xv[:, 1:, fold:2 * fold] - xv[:, :-1, fold:2 * fold])
    out = out.at[:, :, 2 * fold:].set(xv[:, :, 2 * fold:])
    return out.reshape(nt, c, h, w)


if __name__ == "__main__":
    k1, k2 = jax.random.split(jax.random.PRNGKey(0))

    # Config 1: fold=2 (2*fold not sublane-aligned) -> full-channel fallback.
    n_segment, n_div, n_batch = 4, 4, 2
    c, h, w = 8, 16, 16
    x1 = jax.random.normal(k1, (n_batch * n_segment, c, h, w), jnp.float32)
    ref1 = _reference(x1, n_segment, n_div)
    out1 = jax.block_until_ready(motion_replace_block_b(x1, n_segment, n_div))
    assert out1.shape == x1.shape
    assert jnp.allclose(out1, ref1, atol=1e-6), "mismatch (fallback path)"

    # Config 2: fold=8 (sublane-aligned) -> aliased diff-channel-only kernel.
    c2 = 32
    x2 = jax.random.normal(k2, (n_batch * n_segment, c2, h, w), jnp.float32)
    ref2 = _reference(x2, n_segment, n_div)
    out2 = jax.block_until_ready(motion_replace_block_b(x2, n_segment, n_div))
    assert out2.shape == x2.shape
    assert jnp.allclose(out2, ref2, atol=1e-6), "mismatch (aliased path)"

    print("KERNEL_OK")
</pallas_src>

<mosaic_0001>
module attributes {stable_mosaic.version = 11 : i64} {
  func.func @_motion_full_kernel(%arg0: i32, %arg1: i32, %arg2: memref<1x4x8x256xf32, #tpu.memory_space<vmem>>, %arg3: memref<1x4x8x256xf32, #tpu.memory_space<vmem>>) attributes {dimension_semantics = [#tpu.dimension_semantics<parallel>, #tpu.dimension_semantics<parallel>], iteration_bounds = array<i64: 2, 1>, scalar_prefetch = 0 : i64, scratch_operands = 0 : i64, tpu.core_type = #tpu.core_type<tc>, window_params = [{transform_indices = @transform_0, window_bounds = array<i64: 1, 4, 8, 256>}, {transform_indices = @transform_1, window_bounds = array<i64: 1, 4, 8, 256>}]} {
    %0 = tpu.iota {dimensions = array<i32: 0>} : vector<8x1xi32>
    %c2_i32 = arith.constant 2 : i32
    %1 = vector.broadcast %c2_i32 : i32 to vector<8x1xi32>
    %2 = arith.cmpi slt, %0, %1 : vector<8x1xi32>
    %c4_i32 = arith.constant 4 : i32
    %3 = vector.broadcast %c4_i32 : i32 to vector<8x1xi32>
    %4 = arith.cmpi slt, %0, %3 : vector<8x1xi32>
    %c0 = arith.constant 0 : index
    %c0_0 = arith.constant 0 : index
    %c0_1 = arith.constant 0 : index
    %c0_2 = arith.constant 0 : index
    %5 = vector.load %arg2[%c0, %c0_0, %c0_1, %c0_2] : memref<1x4x8x256xf32, #tpu.memory_space<vmem>>, vector<1x1x8x256xf32>
    %6 = vector.shape_cast %5 : vector<1x1x8x256xf32> to vector<8x256xf32>
    %c0_3 = arith.constant 0 : index
    %c1 = arith.constant 1 : index
    %c0_4 = arith.constant 0 : index
    %c0_5 = arith.constant 0 : index
    %7 = vector.load %arg2[%c0_3, %c1, %c0_4, %c0_5] : memref<1x4x8x256xf32, #tpu.memory_space<vmem>>, vector<1x1x8x256xf32>
    %8 = vector.shape_cast %7 : vector<1x1x8x256xf32> to vector<8x256xf32>
    %9 = arith.subf %8, %6 : vector<8x256xf32>
    %cst = arith.constant 0.000000e+00 : f32
    %10 = vector.broadcast %cst : f32 to vector<8x256xf32>
    %11 = vector.shape_cast %4 : vector<8x1xi1> to vector<8x1xi1>
    %12 = vector.broadcast %11 : vector<8x1xi1> to vector<8x256xi1>
    %13 = arith.select %12, %10, %6 : vector<8x256xi1>, vector<8x256xf32>
    %14 = vector.shape_cast %2 : vector<8x1xi1> to vector<8x1xi1>
    %15 = vector.broadcast %14 : vector<8x1xi1> to vector<8x256xi1>
    %16 = arith.select %15, %9, %13 : vector<8x256xi1>, vector<8x256xf32>
    %c0_6 = arith.constant 0 : index
    %c0_7 = arith.constant 0 : index
    %c0_8 = arith.constant 0 : index
    %c0_9 = arith.constant 0 : index
    %17 = vector.load %arg3[%c0_6, %c0_7, %c0_8, %c0_9] : memref<1x4x8x256xf32, #tpu.memory_space<vmem>>, vector<1x1x8x256xf32>
    %18 = vector.shape_cast %17 : vector<1x1x8x256xf32> to vector<8x256xf32>
    %19 = vector.shape_cast %16 : vector<8x256xf32> to vector<1x1x8x256xf32>
    tpu.vector_store %arg3[%c0_6, %c0_7, %c0_8, %c0_9], %19 {strides = array<i32>} : memref<1x4x8x256xf32, #tpu.memory_space<vmem>>, vector<1x1x8x256xf32>,
    %c0_10 = arith.constant 0 : index
    %c2 = arith.constant 2 : index
    %c0_11 = arith.constant 0 : index
    %c0_12 = arith.constant 0 : index
    %20 = vector.load %arg2[%c0_10, %c2, %c0_11, %c0_12] : memref<1x4x8x256xf32, #tpu.memory_space<vmem>>, vector<1x1x8x256xf32>
    %21 = vector.shape_cast %20 : vector<1x1x8x256xf32> to vector<8x256xf32>
    %22 = arith.subf %21, %8 : vector<8x256xf32>
    %23 = arith.subf %8, %6 : vector<8x256xf32>
    %24 = vector.shape_cast %4 : vector<8x1xi1> to vector<8x1xi1>
    %25 = vector.broadcast %24 : vector<8x1xi1> to vector<8x256xi1>
    %26 = arith.select %25, %23, %8 : vector<8x256xi1>, vector<8x256xf32>
    %27 = vector.shape_cast %2 : vector<8x1xi1> to vector<8x1xi1>
    %28 = vector.broadcast %27 : vector<8x1xi1> to vector<8x256xi1>
    %29 = arith.select %28, %22, %26 : vector<8x256xi1>, vector<8x256xf32>
    %c0_13 = arith.constant 0 : index
    %c1_14 = arith.constant 1 : index
    %c0_15 = arith.constant 0 : index
    %c0_16 = arith.constant 0 : index
    %30 = vector.load %arg3[%c0_13, %c1_14, %c0_15, %c0_16] : memref<1x4x8x256xf32, #tpu.memory_space<vmem>>, vector<1x1x8x256xf32>
    %31 = vector.shape_cast %30 : vector<1x1x8x256xf32> to vector<8x256xf32>
    %32 = vector.shape_cast %29 : vector<8x256xf32> to vector<1x1x8x256xf32>
    tpu.vector_store %arg3[%c0_13, %c1_14, %c0_15, %c0_16], %32 {strides = array<i32>} : memref<1x4x8x256xf32, #tpu.memory_space<vmem>>, vector<1x1x8x256xf32>,
    %c0_17 = arith.constant 0 : index
    %c3 = arith.constant 3 : index
    %c0_18 = arith.constant 0 : index
    %c0_19 = arith.constant 0 : index
    %33 = vector.load %arg2[%c0_17, %c3, %c0_18, %c0_19] : memref<1x4x8x256xf32, #tpu.memory_space<vmem>>, vector<1x1x8x256xf32>
    %34 = vector.shape_cast %33 : vector<1x1x8x256xf32> to vector<8x256xf32>
    %35 = arith.subf %34, %21 : vector<8x256xf32>
    %36 = arith.subf %21, %8 : vector<8x256xf32>
    %37 = vector.shape_cast %4 : vector<8x1xi1> to vector<8x1xi1>
    %38 = vector.broadcast %37 : vector<8x1xi1> to vector<8x256xi1>
    %39 = arith.select %38, %36, %21 : vector<8x256xi1>, vector<8x256xf32>
    %40 = vector.shape_cast %2 : vector<8x1xi1> to vector<8x1xi1>
    %41 = vector.broadcast %40 : vector<8x1xi1> to vector<8x256xi1>
    %42 = arith.select %41, %35, %39 : vector<8x256xi1>, vector<8x256xf32>
    %c0_20 = arith.constant 0 : index
    %c2_21 = arith.constant 2 : index
    %c0_22 = arith.constant 0 : index
    %c0_23 = arith.constant 0 : index
    %43 = vector.load %arg3[%c0_20, %c2_21, %c0_22, %c0_23] : memref<1x4x8x256xf32, #tpu.memory_space<vmem>>, vector<1x1x8x256xf32>
    %44 = vector.shape_cast %43 : vector<1x1x8x256xf32> to vector<8x256xf32>
    %45 = vector.shape_cast %42 : vector<8x256xf32> to vector<1x1x8x256xf32>
    tpu.vector_store %arg3[%c0_20, %c2_21, %c0_22, %c0_23], %45 {strides = array<i32>} : memref<1x4x8x256xf32, #tpu.memory_space<vmem>>, vector<1x1x8x256xf32>,
    %cst_24 = arith.constant 0.000000e+00 : f32
    %46 = vector.broadcast %cst_24 : f32 to vector<8x256xf32>
    %47 = arith.subf %34, %21 : vector<8x256xf32>
    %48 = vector.shape_cast %4 : vector<8x1xi1> to vector<8x1xi1>
    %49 = vector.broadcast %48 : vector<8x1xi1> to vector<8x256xi1>
    %50 = arith.select %49, %47, %34 : vector<8x256xi1>, vector<8x256xf32>
    %51 = vector.shape_cast %2 : vector<8x1xi1> to vector<8x1xi1>
    %52 = vector.broadcast %51 : vector<8x1xi1> to vector<8x256xi1>
    %53 = arith.select %52, %46, %50 : vector<8x256xi1>, vector<8x256xf32>
    %c0_25 = arith.constant 0 : index
    %c3_26 = arith.constant 3 : index
    %c0_27 = arith.constant 0 : index
    %c0_28 = arith.constant 0 : index
    %54 = vector.load %arg3[%c0_25, %c3_26, %c0_27, %c0_28] : memref<1x4x8x256xf32, #tpu.memory_space<vmem>>, vector<1x1x8x256xf32>
    %55 = vector.shape_cast %54 : vector<1x1x8x256xf32> to vector<8x256xf32>
    %56 = vector.shape_cast %53 : vector<8x256xf32> to vector<1x1x8x256xf32>
    tpu.vector_store %arg3[%c0_25, %c3_26, %c0_27, %c0_28], %56 {strides = array<i32>} : memref<1x4x8x256xf32, #tpu.memory_space<vmem>>, vector<1x1x8x256xf32>,
    return
  }
  func.func @transform_0(%arg0: i32, %arg1: i32) -> (i32, i32, i32, i32) {
    %c0_i32 = arith.constant 0 : i32
    %c0_i32_0 = arith.constant 0 : i32
    %c0_i32_1 = arith.constant 0 : i32
    return %arg0, %c0_i32, %c0_i32_0, %arg1 : i32, i32, i32, i32
  }
  func.func @transform_1(%arg0: i32, %arg1: i32) -> (i32, i32, i32, i32) {
    %c0_i32 = arith.constant 0 : i32
    %c0_i32_0 = arith.constant 0 : i32
    %c0_i32_1 = arith.constant 0 : i32
    return %arg0, %c0_i32, %c0_i32_0, %arg1 : i32, i32, i32, i32
  }
}

</mosaic_0001>

<bundles_post_ra>
// kernel: tpu_custom_call.1
= control target key start
LH: loop header
LB: loop body
LE: loop exit
PB: predicated region body
PF: predicated region fallthrough
CT: control target
= control target key end

     0   :  { %6 = vsyncpa [#allocation3], 0  ;;  %s737_s0 = inlined_call_operand.hbm [shape: f32[2,4,8,256], index: 0, kind: input, shape index: {}]   ;;  %s738_s1 = inlined_call_operand.hbm [shape: f32[2,4,8,256], index: 1, kind: output, shape index: {}]  }
   0x1   :  { %8 = vsyncpa [#allocation3 + $0x1], 0 }
   0x2   :  { %9 = vsyncpa [#allocation4], 0 }
   0x3   :  { %11 = vsyncpa [#allocation4 + $0x1], 0  ;;  %s535_s6 = smov 0   ;;  %s537_s7 = smov 0  }
   0x4   :  { %s539_s8 = smov 0   ;;  %s541_s9 = smov 0  }
   0x5   :  { %s543_s10 = smov 0   ;;  %s545_s11 = smov 0  }
   0x6 LB: > { %s310_s12 = sadd.s32 4294967295, %s517_s11   ;;  %s311_s13 = sadd.s32 4294967294, %s517_s11   ;;  %s517_s11 = sphi %s545_s11, %s17_s11   ;;  %s513_s10 = sphi %s543_s10, %s753_s10   ;;  %s509_s9 = sphi %s541_s9, %s752_s9   ;;  %s505_s8 = sphi %s539_s8, %s751_s8   ;;  %s501_s7 = sphi %s537_s7, %s750_s7   ;;  %s497_s6 = sphi %s535_s6, %s749_s6  }
   0x7   : > { %s29_s14 = sadd.s32 1, %s513_s10  ;;  %s38_s15 = sadd.s32 1, %s505_s8 }
   0x8   : > { %p31_p0 = scmp.ge.s32.totalorder %s29_s14, 2  ;;  %p45_p1 = scmp.ne.s32.totalorder %s505_s8, %s501_s7 }
   0x9   : > { %p46_p2 = scmp.eq.s32.totalorder %s517_s11, 0  ;;  %p51_p3 = scmp.ne.s32.totalorder %s501_s7, %s497_s6 }
   0xa   : > { %s755_s14 = smov (%p31_p0, %s29_s14), 0  ;;  %p52_p5 = scmp.eq.s32.totalorder %s310_s12, 0 }
   0xb   : > { %p576_p4 = por %p46_p2, %p45_p1  ;;  %s33_s17 = ssub.s32 %s513_s10, %s755_s14 }
   0xc   : > { %p77_p6 = scmp.eq.s32.totalorder %s310_s12, 1  ;;  %p36_p7 = scmp.eq.s32.totalorder %s33_s17, 0 }
   0xd   : > { %p582_p8 = por %p52_p5, %p51_p3  ;;  %p83_p10 = scmp.eq.s32.totalorder %s311_s13, 1 }
   0xe   : > { %p586_p9 = por %p77_p6, %p45_p1  ;;  %p351_p13 = scmp.lt.s32.totalorder %s517_s11, 2 }
   0xf   : > { %s591_s20 = scalar_select %p36_p7, %s505_s8, %s38_s15  }
  0x10   : > { %s742_s19 = scalar_select %p586_p9, 1, 0 }
  0x11   : > { %p593_p11 = por %p83_p10, %p51_p3  ;;  %s103_s22 = sand.u32 1, %s505_s8  }
  0x12   : > { %s314_s23 = sshll.u32 %s103_s22, 6  ;;  %s337_s24 = sshll.u32 %s513_s10, 10 }
  0x13   : > { %s743_s21 = scalar_select %p593_p11, 1, 0 }
  0x14   : > { %s604_s27 = scalar_lea.hbm %s737_s0, %s337_s24  ;;  %s107_s28 = scalar_lea.vmem [#allocation2], %s314_s23 }
  0x15   : > { %s116_s29 = sshll.u32 %s107_s28, 4  ;;  %p610_p0 = pnand %p351_p13, %p576_p4  ;;  %s606_s29 = int_to_ptr.vmem [resolvable:$true] %s116_s29 }
  0x16   : > { %s615_s2 = scalar_lea.sflag [#allocation3], %s103_s22  ;;  %s405_s3 = scalar_lea.hbm %s604_s27, 1024 }
  0x17   : > { %p406_p2 = scmp.ne.s32.totalorder %s604_s27, %s405_s3  ;;  %p407_p3 = pneg %p610_p0 }
  0x18   : > { %s410_s12 = scalar_lea.hbm %s737_s0, 2048  ;;  %p411_p4 = scmp.lt.u32.totalorder %s604_s27, %s737_s0 }
  0x19   : > { %p408_p5 = pnand %p407_p3, %p406_p2  ;;  %p412_p7 = scmp.lt.u32.totalorder %s410_s12, %s405_s3 }
  0x1a   : > { %p414_p13 = scmp.lt.u32.totalorder %s405_s3, %s604_s27 }
  0x1b   : > { %p409_p6 = pneg %p408_p5  ;;  %p413_p10 = por %p412_p7, %p411_p4 }
  0x1d   : > { %p415_p12 = por %p414_p13, %p413_p10 }
  0x1f   : > { %p416_p1 = pnand %p415_p12, %p409_p6 }
  0x21   : > { %419 = shalt.err (!%p416_p1)
}
  0x22   : > { %s420_s16 = scalar_lea.vmem %s606_s29, 1024  ;;  %s519_s17 = smov [#allocation2]  }
  0x23   : > { %p421_p2 = scmp.ne.s32.totalorder %s606_s29, %s420_s16  ;;  %s425_s22 = sshll.u32 %s519_s17, 4  ;;  %s426_s22 = int_to_ptr.vmem [resolvable:$false] %s425_s22 }
  0x24   : > { %s427_s23 = scalar_lea.vmem %s426_s22, 2048  ;;  %p428_p9 = scmp.lt.s32.totalorder %s606_s29, %s426_s22 }
  0x25   : > { %p423_p5 = pnand %p421_p2, %p407_p3  ;;  %p429_p4 = scmp.lt.s32.totalorder %s427_s23, %s420_s16 }
  0x27   : > { %p424_p11 = pneg %p423_p5  ;;  %p430_p7 = por %p429_p4, %p428_p9 }
  0x29   : > { %p431_p10 = pnand %p430_p7, %p424_p11 }
  0x2b   : > { %434 = shalt.err (!%p431_p10)
}
  0x2c   : > { %s520_s24 = smov 256   ;;  %s521_s25 = smov 16  }
  0x2d   : > { %346 = dma.hbm_to_vmem [thread:$0]  (!%p610_p0), %s604_s27, 1024, %s606_s29, %s615_s2, %s520_s24, %s520_s24, %s521_s25  }
  0x2e   : > { %p124_p12 = scmp.lt.s32.totalorder %s517_s11, 3  ;;  %p745_p1 = scmp.ge.s32.totalorder %s517_s11, 1 }
  0x30   : > { %p125_p3 = pnand %p745_p1, %p124_p12 }
  0x31   : > { %s647_s26 = sand.u32 (!%p125_p3), 1, %s501_s7  }
  0x32   : > { %128 = sbr.rel (%p125_p3) target bundleno = 85 (0x55), region = 24  ;;  %s318_s28 = sshll.u32 (!%p125_p3), %s647_s26, 6 }
  0x33   : > { %s131_s3 = scalar_lea.sflag (!%p125_p3), [#allocation3], %s647_s26  ;;  %s134_s4 = scalar_lea.vmem (!%p125_p3), [#allocation2], %s318_s28 }
  0x39   : > { %488 = dma.done.wait (%p582_p8), %s131_s3, 1024  }
  0x3a   : > { %490 = vsyncadd (%p582_p8), %s131_s3, 4294966272  ;;  %v155_v0 = vlaneseq  ;;  %v159_v2 = vld [vmem:[%s134_s4] sm:$0xff]  ;;  %v320_v3 = vld [vmem:[%s134_s4 + $0x10] sm:$0xff]  ;;  %s657_s27 = scalar_lea.vmem [#allocation5], %s318_s28  ;;  %s338_s29 = sshll.u32 %s509_s9, 10 }
  0x3b   : > { %v160_v4 = vld [vmem:[%s134_s4 + $0x8] sm:$0xff]  ;;  %v164_v5 = vsub.f32 %v320_v3, %v159_v2  ;;  %v321_v7 = vld [vmem:[%s134_s4 + $0x18] sm:$0xff]  ;;  %v322_v9 = vld [vmem:[%s134_s4 + $0x20] sm:$0xff]  ;;  %s223_s18 = sshll.u32 %s657_s27, 4  ;;  %s679_s2 = scalar_lea.hbm %s738_s1, %s338_s29  ;;  %s668_s18 = int_to_ptr.vmem [resolvable:$true] %s223_s18 }
  0x3c   : > { %v156_v1 = vshrl.u32 %v155_v0, 7  ;;  %v323_v10 = vld [vmem:[%s134_s4 + $0x28] sm:$0xff]  ;;  %v165_v11 = vsub.f32 %v321_v7, %v160_v4  ;;  %v179_v12 = vsub.f32 %v322_v9, %v320_v3  ;;  %v326_v14 = vld [vmem:[%s134_s4 + $0x30] sm:$0xff]  ;;  %v327_v15 = vld [vmem:[%s134_s4 + $0x38] sm:$0xff]  ;;  %s208_s5 = scalar_lea.sflag [#allocation4], %s647_s26  ;;  %s435_s12 = scalar_lea.vmem %s668_s18, 1024 }
  0x3d   : > { %v180_v13 = vsub.f32 %v323_v10, %v321_v7  ;;  %v191_v18 = vsub.f32 %v326_v14, %v322_v9  ;;  %v192_v19 = vsub.f32 %v327_v15, %v323_v10  ;;  %p436_p8 = scmp.ne.s32.totalorder %s668_s18, %s435_s12  ;;  %p746_p9 = scmp.ne.s32.totalorder %s742_s19, 0 }
  0x3e   : > { %vm158_vm0 = vcmp.lt.s32.totalorder %v156_v1, 4  ;;  %vm157_vm1 = vcmp.lt.s32.totalorder %v156_v1, 2  ;;  %s522_s13 = smov [#allocation5]  }
  0x3f   : > { %v168_v6 = vsel %vm158_vm0, 0.0, %v159_v2  ;;  %v169_v8 = vsel %vm158_vm0, 0.0, %v160_v4  ;;  %v181_v17 = vsel %vm158_vm0, %v164_v5, %v320_v3  ;;  %v182_v22 = vsel %vm158_vm0, %v165_v11, %v321_v7  ;;  %p437_p11 = pnand %p436_p8, %p746_p9  ;;  %s439_s15 = sshll.u32 %s522_s13, 4  ;;  %s440_s15 = int_to_ptr.vmem [resolvable:$false] %s439_s15 }
  0x40   : > { %v172_v16 = vsel %vm157_vm1, %v164_v5, %v168_v6  ;;  %v173_v20 = vsel %vm157_vm1, %v165_v11, %v169_v8  ;;  %v183_v21 = vsel %vm157_vm1, %v179_v12, %v181_v17  ;;  %v193_v23 = vsel %vm158_vm0, %v179_v12, %v322_v9  ;;  %s441_s16 = scalar_lea.vmem %s440_s15, 2048  ;;  %p442_p6 = scmp.lt.s32.totalorder %s668_s18, %s440_s15 }
  0x41   : > { %174 = vst [vmem:[%s657_s27] sm:$0xff] %v172_v16  ;;  %175 = vst [vmem:[%s657_s27 + $0x8] sm:$0xff] %v173_v20  ;;  %v184_v24 = vsel %vm157_vm1, %v180_v13, %v182_v22  ;;  %v195_v25 = vsel %vm157_vm1, %v191_v18, %v193_v23  ;;  %v194_v26 = vsel %vm158_vm0, %v180_v13, %v323_v10  ;;  %p438_p0 = pneg %p437_p11  ;;  %p443_p13 = scmp.lt.s32.totalorder %s441_s16, %s435_s12 }
  0x42   : > { %324 = vst [vmem:[%s657_s27 + $0x10] sm:$0xff] %v183_v21  ;;  %v200_v27 = vsel %vm158_vm0, %v191_v18, %v326_v14  ;;  %325 = vst [vmem:[%s657_s27 + $0x18] sm:$0xff] %v184_v24  ;;  %v196_v28 = vsel %vm157_vm1, %v192_v19, %v194_v26  ;;  %v201_v30 = vsel %vm158_vm0, %v192_v19, %v327_v15 }
  0x43   : > { %328 = vst [vmem:[%s657_s27 + $0x20] sm:$0xff] %v195_v25  ;;  %v202_v29 = vsel %vm157_vm1, 0.0, %v200_v27  ;;  %329 = vst [vmem:[%s657_s27 + $0x28] sm:$0xff] %v196_v28  ;;  %v203_v31 = vsel %vm157_vm1, 0.0, %v201_v30  ;;  %p444_p2 = por %p443_p13, %p442_p6 }
  0x44   : > { %330 = vst [vmem:[%s657_s27 + $0x30] sm:$0xff] %v202_v29  ;;  %331 = vst [vmem:[%s657_s27 + $0x38] sm:$0xff] %v203_v31 }
  0x45   : > { %p445_p5 = pnand %p444_p2, %p438_p0 }
  0x47   : > { %448 = shalt.err (!%p445_p5)
}
  0x48   : > { %s449_s17 = scalar_lea.hbm %s679_s2, 1024  ;;  %s453_s24 = scalar_lea.hbm %s738_s1, 2048 }
  0x49   : > { %p450_p4 = scmp.ne.s32.totalorder %s679_s2, %s449_s17  ;;  %p454_p12 = scmp.lt.u32.totalorder %s679_s2, %s738_s1 }
  0x4a   : > { %p455_p1 = scmp.lt.u32.totalorder %s453_s24, %s449_s17  ;;  %p457_p8 = scmp.lt.u32.totalorder %s449_s17, %s679_s2 }
  0x4b   : > { %p451_p7 = pnand %p450_p4, %p746_p9 }
  0x4c   : > { %p456_p3 = por %p455_p1, %p454_p12 }
  0x4d   : > { %p452_p10 = pneg %p451_p7 }
  0x4e   : > { %p458_p11 = por %p457_p8, %p456_p3 }
  0x50   : > { %p459_p0 = pnand %p458_p11, %p452_p10 }
  0x52   : > { %462 = shalt.err (!%p459_p0)
}
  0x53   : > { %s523_s3 = smov 256   ;;  %s524_s4 = smov 16  }
  0x54   : > { %341 = dma.vmem_to_hbm [thread:$0]  (%p746_p9), %s668_s18, 1024, %s679_s2, %s208_s5, %s523_s3, %s523_s3, %s524_s4  }
  0x55 PF: > { %s238_s27 = sand.u32 1, %s497_s6   ;;  %p747_p6 = scmp.ne.s32.totalorder %s743_s21, 0 }
  0x56   : > { %p748_p13 = scmp.ge.s32.totalorder %s517_s11, 2  ;;  %s239_s29 = scalar_lea.sflag [#allocation4], %s238_s27 }
  0x58   : > { %p348_p2 = pnand %p748_p13, %p747_p6 }
  0x5a   : > { %492 = dma.done.wait (!%p348_p2), %s239_s29, 1024  }
  0x5b   : > { %494 = vsyncadd (!%p348_p2), %s239_s29, 4294966272  ;;  %s17_s11 = sadd.s32 1, %s517_s11   ;;  %s749_s6 = smov %s501_s7 }
  0x5c   : > { %p14_p5 = scmp.ge.s32.totalorder %s17_s11, 4   ;;  %s750_s7 = smov %s505_s8 }
  0x5d   : > { %s751_s8 = smov %s591_s20  ;;  %s752_s9 = smov %s513_s10 }
  0x5e   : > { %s753_s10 = smov %s755_s14  ;;  %16 = sbr.rel (!%p14_p5) target bundleno = 6 (0x6), region = 75 }
  0x65   :  { %244 = vsyncpa [#allocation3], 1 }
  0x66   :  { %246 = vsyncpa [#allocation3 + $0x1], 1 }
  0x67   :  { %247 = vsyncpa [#allocation4], 1 }
  0x68   :  { %249 = vsyncpa [#allocation4 + $0x1], 1 }

</bundles_post_ra>
